<compile_context>
chip_gen: v7x
topology: tpu7x:2x2x1
jax: 0.10.0
libtpu: 0.0.40
codegen_flags: <defaults>
</compile_context>

<pallas_src>
import functools
import math

import jax
import jax.numpy as jnp
from jax.experimental import pallas as pl
from jax.experimental.pallas import tpu as pltpu


def _make_divisible(value, divisor, min_value=None):
    if min_value is None:
        min_value = divisor
    new_value = max(min_value, int(value + divisor / 2) // divisor * divisor)
    if new_value < 0.9 * value:
        new_value += divisor
    return new_value


def _round_up(a, b):
    return (a + b - 1) // b * b


def _se_kernel(x_ref, m_ref, w1r_ref, b1_ref, w2r_ref, b2r_ref,
               o_ref, acc_ref, gate_ref, *, inv_hw):
    # Grid = (row_tiles, phase, hw_tiles).
    p = pl.program_id(1)
    t = pl.program_id(2)

    # ---- phase 0, first spatial tile of this row tile: zero the accumulator ----
    @pl.when(jnp.logical_and(p == 0, t == 0))
    def _init():
        acc_ref[...] = jnp.zeros_like(acc_ref)

    # ---- phase 0: accumulate per-row partial sums (VPU only, f32 accum) ----
    @pl.when(p == 0)
    def _accumulate():
        x_nat = x_ref[...]                                   # (RT, LT), native dtype
        lt = x_nat.shape[-1]                                 # static multiple of 128
        partial = x_nat[:, 0:128].astype(jnp.float32)
        for k in range(1, lt // 128):                        # static unroll, vreg-aligned
            partial = partial + x_nat[:, k * 128:(k + 1) * 128].astype(jnp.float32)
        acc_ref[...] = acc_ref[...] + partial                # (RT, 128)

    # ---- phase boundary: finish pool, fc1 + SiLU, fc2 + sigmoid (f32, tiny) ----
    @pl.when(jnp.logical_and(p == 1, t == 0))
    def _gate():
        # Single 128-wide lane reduce for the whole row tile.
        mean_col = jnp.sum(acc_ref[...], axis=1, keepdims=True) * inv_hw   # (RT, 1)
        # fc1: channel mixing within each batch element via the block-diagonal
        # indicator M -> keeps everything in flat (B*C)-row layout, no reshapes.
        h = jnp.dot(m_ref[...], mean_col * w1r_ref[...],
                    preferred_element_type=jnp.float32) + b1_ref[...]      # (RT, hidden)
        h = h * jax.nn.sigmoid(h)                                          # SiLU
        # fc2: per-row dot with the row-replicated weights.
        s = jnp.sum(h * w2r_ref[...], axis=1, keepdims=True) + b2r_ref[...]  # (RT, 1)
        gate_ref[...] = jax.nn.sigmoid(s)

    # ---- phase 1: gated scale in native dtype, full lane-dense tile store ----
    @pl.when(p == 1)
    def _scale():
        g = gate_ref[...].astype(o_ref.dtype)                # (RT, 1), tiny cast
        o_ref[...] = x_ref[...] * g


def se_layer(x, w1, b1, w2, b2, *,
             lane_tile_target=2048,
             tile_budget_bytes=24 * 1024 * 1024):
    """x: (B, C, H, W).  w1: (hidden, C), b1: (hidden,), w2: (C, hidden), b2: (C,)."""
    B, C, H, W = x.shape
    hidden = w1.shape[0]
    HW = H * W
    R = B * C
    dtype = x.dtype
    itemsize = jnp.dtype(dtype).itemsize

    # Lane-dense 2-D layout: rows = (b, c), lanes = flattened spatial.
    x2 = x.reshape(R, HW)

    # 2x double-buffered input tile + 2x double-buffered output tile must fit.
    def tile_fits(rows, lanes):
        return 4 * rows * lanes * itemsize <= tile_budget_bytes

    # Row tile = whole batch elements (gate is self-contained per tile) with a
    # sublane-aligned row count; prefer >=2 row tiles so the "parallel" row
    # axis can shard across v7x's two TensorCores.
    candidates = []
    for bt in range(B, 0, -1):
        if B % bt != 0:
            continue
        if bt != B and (bt * C) % 8 != 0:
            continue
        if not tile_fits(bt * C, 128):
            continue
        candidates.append(bt)
    b_tile = B
    if candidates:
        multi = [bt for bt in candidates if B // bt >= 2]
        b_tile = multi[0] if multi else candidates[0]
    RT = b_tile * C
    n_row_tiles = R // RT

    # Lane tile: as large as the budget allows (multiple of 128, <= target).
    hw128 = _round_up(HW, 128)
    lane_tile = 128
    while (lane_tile * 2 <= min(lane_tile_target, hw128)
           and tile_fits(RT, lane_tile * 2)):
        lane_tile *= 2
    HW_pad = _round_up(HW, lane_tile)
    n_hw_tiles = HW_pad // lane_tile
    if HW_pad != HW:
        # Zero pad: contributes 0 to the pooled sum; padded output is sliced off.
        x2 = jnp.pad(x2, ((0, 0), (0, HW_pad - HW)))

    # Tiny f32 constants pre-arranged so the gate math stays in flat row layout.
    rows = jnp.arange(RT)
    same_batch = (rows[:, None] // C) == (rows[None, :] // C)
    m_const = same_batch.astype(jnp.float32)                              # (RT, RT)
    w1_rows = jnp.tile(jnp.transpose(w1).astype(jnp.float32), (b_tile, 1))  # (RT, hidden)
    w2_rows = jnp.tile(w2.astype(jnp.float32), (b_tile, 1))                 # (RT, hidden)
    b1_row = b1.astype(jnp.float32).reshape(1, hidden)                      # (1, hidden)
    b2_rows = jnp.tile(b2.astype(jnp.float32), (b_tile,)).reshape(RT, 1)    # (RT, 1)

    grid = (n_row_tiles, 2, n_hw_tiles)      # (row tiles, phase, spatial tiles)

    def const_spec(shape):
        return pl.BlockSpec(shape, lambda r, p, t: (0, 0))

    tile_bytes = RT * lane_tile * itemsize
    vmem_need = 4 * tile_bytes + (RT * 129) * 4 + 2 * 1024 * 1024
    vmem_limit = int(min(64 * 1024 * 1024, max(32 * 1024 * 1024, 2 * vmem_need)))

    kernel = functools.partial(_se_kernel, inv_hw=1.0 / float(HW))

    out2 = pl.pallas_call(
        kernel,
        out_shape=jax.ShapeDtypeStruct((R, HW_pad), dtype),
        grid_spec=pltpu.PrefetchScalarGridSpec(
            num_scalar_prefetch=0,
            grid=grid,
            in_specs=[
                # x: re-streamed in both phases (2 reads total).
                pl.BlockSpec((RT, lane_tile), lambda r, p, t: (r, t)),
                const_spec((RT, RT)),        # block-diagonal batch indicator
                const_spec((RT, hidden)),    # fc1 weights, per-row layout
                const_spec((1, hidden)),     # fc1 bias
                const_spec((RT, hidden)),    # fc2 weights, per-row layout
                const_spec((RT, 1)),         # fc2 bias, per-row layout
            ],
            # During phase 0 the output block index stays at (r, 0) so no extra
            # HBM writeback happens; phase 1 writes each block exactly once.
            out_specs=pl.BlockSpec((RT, lane_tile), lambda r, p, t: (r, t * p)),
            scratch_shapes=[
                pltpu.VMEM((RT, 128), jnp.float32),   # per-row partial sums
                pltpu.VMEM((RT, 1), jnp.float32),     # per-row sigmoid gate
            ],
        ),
        compiler_params=pltpu.CompilerParams(
            dimension_semantics=("parallel", "arbitrary", "arbitrary"),
            vmem_limit_bytes=vmem_limit,
        ),
    )(x2, m_const, w1_rows, b1_row, w2_rows, b2_rows)

    if HW_pad != HW:
        out2 = out2[:, :HW]
    return out2.reshape(B, C, H, W)


if __name__ == "__main__":
    # Module config: SELayer(inp=4, oup=4, reduction=4) -> hidden = _make_divisible(1, 8) = 8
    inp, oup, reduction = 4, 4, 4
    hidden = _make_divisible(inp // reduction, 8)

    B, C, Hs, Ws = 2, oup, 16, 16

    key = jax.random.PRNGKey(0)
    kx, k1, k2, k3, k4 = jax.random.split(key, 5)

    x = jax.random.normal(kx, (B, C, Hs, Ws), dtype=jnp.float32)

    # Deterministic param init mimicking nn.Linear's uniform(-1/sqrt(fan_in), 1/sqrt(fan_in))
    bound1 = 1.0 / math.sqrt(oup)
    w1 = jax.random.uniform(k1, (hidden, oup), jnp.float32, -bound1, bound1)
    b1 = jax.random.uniform(k2, (hidden,), jnp.float32, -bound1, bound1)
    bound2 = 1.0 / math.sqrt(hidden)
    w2 = jax.random.uniform(k3, (oup, hidden), jnp.float32, -bound2, bound2)
    b2 = jax.random.uniform(k4, (oup,), jnp.float32, -bound2, bound2)

    out = se_layer(x, w1, b1, w2, b2)
    jax.block_until_ready(out)

    # Pure-JAX reference check
    y_ref = jnp.mean(x, axis=(2, 3))
    h_ref = y_ref @ w1.T + b1
    h_ref = h_ref * jax.nn.sigmoid(h_ref)
    s_ref = jax.nn.sigmoid(h_ref @ w2.T + b2)
    ref = x * s_ref[:, :, None, None]
    assert jnp.allclose(out, ref, atol=1e-5, rtol=1e-5), "mismatch vs reference"

    print("KERNEL_OK")
</pallas_src>

<mosaic_0001>
module attributes {stable_mosaic.version = 11 : i64} {
  func.func @_se_kernel(%arg0: i32, %arg1: i32, %arg2: i32, %arg3: memref<8x256xf32, #tpu.memory_space<vmem>>, %arg4: memref<8x8xf32, #tpu.memory_space<vmem>>, %arg5: memref<8x8xf32, #tpu.memory_space<vmem>>, %arg6: memref<1x8xf32, #tpu.memory_space<vmem>>, %arg7: memref<8x8xf32, #tpu.memory_space<vmem>>, %arg8: memref<8x1xf32, #tpu.memory_space<vmem>>, %arg9: memref<8x256xf32, #tpu.memory_space<vmem>>, %arg10: memref<8x128xf32, #tpu.memory_space<vmem>>, %arg11: memref<8x1xf32, #tpu.memory_space<vmem>>) attributes {dimension_semantics = [#tpu.dimension_semantics<parallel>, #tpu.dimension_semantics<arbitrary>, #tpu.dimension_semantics<arbitrary>], iteration_bounds = array<i64: 1, 2, 1>, scalar_prefetch = 0 : i64, scratch_operands = 2 : i64, tpu.core_type = #tpu.core_type<tc>, window_params = [{transform_indices = @transform_0, window_bounds = array<i64: 8, 256>}, {pipeline_mode = #tpu.pipeline_mode<synchronous>, transform_indices = @transform_1, window_bounds = array<i64: 8, 8>}, {pipeline_mode = #tpu.pipeline_mode<synchronous>, transform_indices = @transform_2, window_bounds = array<i64: 8, 8>}, {pipeline_mode = #tpu.pipeline_mode<synchronous>, transform_indices = @transform_3, window_bounds = array<i64: 1, 8>}, {pipeline_mode = #tpu.pipeline_mode<synchronous>, transform_indices = @transform_4, window_bounds = array<i64: 8, 8>}, {pipeline_mode = #tpu.pipeline_mode<synchronous>, transform_indices = @transform_5, window_bounds = array<i64: 8, 1>}, {transform_indices = @transform_6, window_bounds = array<i64: 8, 256>}]} {
    %c0_i32 = arith.constant 0 : i32
    %0 = arith.cmpi eq, %arg1, %c0_i32 : i32
    %c0_i32_0 = arith.constant 0 : i32
    %1 = arith.cmpi eq, %arg2, %c0_i32_0 : i32
    %2 = arith.andi %0, %1 : i1
    %3 = arith.extui %2 : i1 to i32
    %c0_i32_1 = arith.constant 0 : i32
    %4 = arith.cmpi ne, %3, %c0_i32_1 : i32
    scf.if %4 {
      %cst = arith.constant 0.000000e+00 : f32
      %16 = vector.broadcast %cst : f32 to vector<8x128xf32>
      %c0 = arith.constant 0 : index
      %c0_8 = arith.constant 0 : index
      %17 = vector.load %arg10[%c0, %c0_8] : memref<8x128xf32, #tpu.memory_space<vmem>>, vector<8x128xf32>
      tpu.vector_store %arg10[%c0, %c0_8], %16 {strides = array<i32>} : memref<8x128xf32, #tpu.memory_space<vmem>>, vector<8x128xf32>,
    } else {
    }
    %c0_i32_2 = arith.constant 0 : i32
    %5 = arith.cmpi eq, %arg1, %c0_i32_2 : i32
    %6 = arith.extui %5 : i1 to i32
    %c0_i32_3 = arith.constant 0 : i32
    %7 = arith.cmpi ne, %6, %c0_i32_3 : i32
    scf.if %7 {
      %c0 = arith.constant 0 : index
      %c0_8 = arith.constant 0 : index
      %16 = vector.load %arg3[%c0, %c0_8] : memref<8x256xf32, #tpu.memory_space<vmem>>, vector<8x256xf32>
      %17 = vector.extract_strided_slice %16 {offsets = [0, 0], sizes = [8, 128], strides = [1, 1]} : vector<8x256xf32> to vector<8x128xf32>
      %18 = vector.extract_strided_slice %16 {offsets = [0, 128], sizes = [8, 128], strides = [1, 1]} : vector<8x256xf32> to vector<8x128xf32>
      %19 = arith.addf %17, %18 : vector<8x128xf32>
      %c0_9 = arith.constant 0 : index
      %c0_10 = arith.constant 0 : index
      %20 = vector.load %arg10[%c0_9, %c0_10] : memref<8x128xf32, #tpu.memory_space<vmem>>, vector<8x128xf32>
      %21 = arith.addf %20, %19 : vector<8x128xf32>
      %c0_11 = arith.constant 0 : index
      %c0_12 = arith.constant 0 : index
      %22 = vector.load %arg10[%c0_11, %c0_12] : memref<8x128xf32, #tpu.memory_space<vmem>>, vector<8x128xf32>
      tpu.vector_store %arg10[%c0_11, %c0_12], %21 {strides = array<i32>} : memref<8x128xf32, #tpu.memory_space<vmem>>, vector<8x128xf32>,
    } else {
    }
    %c1_i32 = arith.constant 1 : i32
    %8 = arith.cmpi eq, %arg1, %c1_i32 : i32
    %c0_i32_4 = arith.constant 0 : i32
    %9 = arith.cmpi eq, %arg2, %c0_i32_4 : i32
    %10 = arith.andi %8, %9 : i1
    %11 = arith.extui %10 : i1 to i32
    %c0_i32_5 = arith.constant 0 : i32
    %12 = arith.cmpi ne, %11, %c0_i32_5 : i32
    scf.if %12 {
      %c0 = arith.constant 0 : index
      %c0_8 = arith.constant 0 : index
      %16 = vector.load %arg10[%c0, %c0_8] : memref<8x128xf32, #tpu.memory_space<vmem>>, vector<8x128xf32>
      %cst = arith.constant dense<0.000000e+00> : vector<8xf32>
      %17 = vector.multi_reduction <add>, %16, %cst [1] : vector<8x128xf32> to vector<8xf32>
      %18 = vector.shape_cast %17 : vector<8xf32> to vector<8x1xf32>
      %cst_9 = arith.constant 3.906250e-03 : f32
      %19 = vector.broadcast %cst_9 : f32 to vector<8x1xf32>
      %20 = arith.mulf %18, %19 : vector<8x1xf32>
      %c0_10 = arith.constant 0 : index
      %c0_11 = arith.constant 0 : index
      %21 = vector.load %arg4[%c0_10, %c0_11] : memref<8x8xf32, #tpu.memory_space<vmem>>, vector<8x8xf32>
      %c0_12 = arith.constant 0 : index
      %c0_13 = arith.constant 0 : index
      %22 = vector.load %arg5[%c0_12, %c0_13] : memref<8x8xf32, #tpu.memory_space<vmem>>, vector<8x8xf32>
      %23 = vector.broadcast %20 : vector<8x1xf32> to vector<8x8xf32>
      %24 = arith.mulf %23, %22 : vector<8x8xf32>
      %cst_14 = arith.constant dense<0.000000e+00> : vector<8x8xf32>
      %25 = tpu.matmul %21, %24, %cst_14 {dimension_numbers = #tpu.dot_dimension_numbers<[1], [0], [0], [1], [0, 0, 1, 1], [], []>} : vector<8x8xf32>, vector<8x8xf32>, vector<8x8xf32> -> vector<8x8xf32>
      %c0_15 = arith.constant 0 : index
      %c0_16 = arith.constant 0 : index
      %26 = vector.load %arg6[%c0_15, %c0_16] : memref<1x8xf32, #tpu.memory_space<vmem>>, vector<1x8xf32>
      %27 = vector.broadcast %26 : vector<1x8xf32> to vector<8x8xf32>
      %28 = arith.addf %25, %27 : vector<8x8xf32>
      %29 = arith.negf %28 : vector<8x8xf32>
      %30 = math.exp %29 : vector<8x8xf32>
      %cst_17 = arith.constant 1.000000e+00 : f32
      %31 = vector.broadcast %cst_17 : f32 to vector<8x8xf32>
      %32 = arith.addf %31, %30 : vector<8x8xf32>
      %33 = arith.divf %31, %32 : vector<8x8xf32>
      %34 = arith.mulf %28, %33 : vector<8x8xf32>
      %c0_18 = arith.constant 0 : index
      %c0_19 = arith.constant 0 : index
      %35 = vector.load %arg7[%c0_18, %c0_19] : memref<8x8xf32, #tpu.memory_space<vmem>>, vector<8x8xf32>
      %36 = arith.mulf %34, %35 : vector<8x8xf32>
      %cst_20 = arith.constant dense<0.000000e+00> : vector<8xf32>
      %37 = vector.multi_reduction <add>, %36, %cst_20 [1] : vector<8x8xf32> to vector<8xf32>
      %38 = vector.shape_cast %37 : vector<8xf32> to vector<8x1xf32>
      %c0_21 = arith.constant 0 : index
      %c0_22 = arith.constant 0 : index
      %39 = vector.load %arg8[%c0_21, %c0_22] : memref<8x1xf32, #tpu.memory_space<vmem>>, vector<8x1xf32>
      %40 = arith.addf %38, %39 : vector<8x1xf32>
      %41 = arith.negf %40 : vector<8x1xf32>
      %42 = math.exp %41 : vector<8x1xf32>
      %cst_23 = arith.constant 1.000000e+00 : f32
      %43 = vector.broadcast %cst_23 : f32 to vector<8x1xf32>
      %44 = arith.addf %43, %42 : vector<8x1xf32>
      %45 = arith.divf %43, %44 : vector<8x1xf32>
      %c0_24 = arith.constant 0 : index
      %c0_25 = arith.constant 0 : index
      %46 = vector.load %arg11[%c0_24, %c0_25] : memref<8x1xf32, #tpu.memory_space<vmem>>, vector<8x1xf32>
      tpu.vector_store %arg11[%c0_24, %c0_25], %45 {strides = array<i32>} : memref<8x1xf32, #tpu.memory_space<vmem>>, vector<8x1xf32>,
    } else {
    }
    %c1_i32_6 = arith.constant 1 : i32
    %13 = arith.cmpi eq, %arg1, %c1_i32_6 : i32
    %14 = arith.extui %13 : i1 to i32
    %c0_i32_7 = arith.constant 0 : i32
    %15 = arith.cmpi ne, %14, %c0_i32_7 : i32
    scf.if %15 {
      %c0 = arith.constant 0 : index
      %c0_8 = arith.constant 0 : index
      %16 = vector.load %arg11[%c0, %c0_8] : memref<8x1xf32, #tpu.memory_space<vmem>>, vector<8x1xf32>
      %c0_9 = arith.constant 0 : index
      %c0_10 = arith.constant 0 : index
      %17 = vector.load %arg3[%c0_9, %c0_10] : memref<8x256xf32, #tpu.memory_space<vmem>>, vector<8x256xf32>
      %18 = vector.broadcast %16 : vector<8x1xf32> to vector<8x256xf32>
      %19 = arith.mulf %17, %18 : vector<8x256xf32>
      %c0_11 = arith.constant 0 : index
      %c0_12 = arith.constant 0 : index
      %20 = vector.load %arg9[%c0_11, %c0_12] : memref<8x256xf32, #tpu.memory_space<vmem>>, vector<8x256xf32>
      tpu.vector_store %arg9[%c0_11, %c0_12], %19 {strides = array<i32>} : memref<8x256xf32, #tpu.memory_space<vmem>>, vector<8x256xf32>,
    } else {
    }
    return
  }
  func.func @transform_0(%arg0: i32, %arg1: i32, %arg2: i32) -> (i32, i32) {
    %c0_i32 = arith.constant 0 : i32
    return %arg0, %arg2 : i32, i32
  }
  func.func @transform_1(%arg0: i32, %arg1: i32, %arg2: i32) -> (i32, i32) {
    %c0_i32 = arith.constant 0 : i32
    %c0_i32_0 = arith.constant 0 : i32
    %c0_i32_1 = arith.constant 0 : i32
    return %c0_i32, %c0_i32_0 : i32, i32
  }
  func.func @transform_2(%arg0: i32, %arg1: i32, %arg2: i32) -> (i32, i32) {
    %c0_i32 = arith.constant 0 : i32
    %c0_i32_0 = arith.constant 0 : i32
    %c0_i32_1 = arith.constant 0 : i32
    return %c0_i32, %c0_i32_0 : i32, i32
  }
  func.func @transform_3(%arg0: i32, %arg1: i32, %arg2: i32) -> (i32, i32) {
    %c0_i32 = arith.constant 0 : i32
    %c0_i32_0 = arith.constant 0 : i32
    %c0_i32_1 = arith.constant 0 : i32
    return %c0_i32, %c0_i32_0 : i32, i32
  }
  func.func @transform_4(%arg0: i32, %arg1: i32, %arg2: i32) -> (i32, i32) {
    %c0_i32 = arith.constant 0 : i32
    %c0_i32_0 = arith.constant 0 : i32
    %c0_i32_1 = arith.constant 0 : i32
    return %c0_i32, %c0_i32_0 : i32, i32
  }
  func.func @transform_5(%arg0: i32, %arg1: i32, %arg2: i32) -> (i32, i32) {
    %c0_i32 = arith.constant 0 : i32
    %c0_i32_0 = arith.constant 0 : i32
    %c0_i32_1 = arith.constant 0 : i32
    return %c0_i32, %c0_i32_0 : i32, i32
  }
  func.func @transform_6(%arg0: i32, %arg1: i32, %arg2: i32) -> (i32, i32) {
    %0 = arith.muli %arg2, %arg1 : i32
    %c0_i32 = arith.constant 0 : i32
    return %arg0, %0 : i32, i32
  }
}

</mosaic_0001>

<bundles_post_ra>
// kernel: tpu_custom_call.1
= control target key start
LH: loop header
LB: loop body
LE: loop exit
PB: predicated region body
PF: predicated region fallthrough
CT: control target
= control target key end

     0   :  { %11 = vsyncpa [#allocation5], 0  ;;  %s959_s0 = inlined_call_operand.hbm [shape: f32[8,256], index: 0, kind: input, shape index: {}]   ;;  %s960_s1 = inlined_call_operand.vmem [shape: f32[8,8], index: 1, kind: input, shape index: {}]   ;;  %s961_s2 = inlined_call_operand.vmem [shape: f32[8,8], index: 2, kind: input, shape index: {}]   ;;  %s962_s3 = inlined_call_operand.hbm [shape: f32[1,8], index: 3, kind: input, shape index: {}]   ;;  %s963_s4 = inlined_call_operand.vmem [shape: f32[8,8], index: 4, kind: input, shape index: {}]   ;;  %s964_s5 = inlined_call_operand.vmem [shape: f32[8,1], index: 5, kind: input, shape index: {}]   ;;  %s965_s6 = inlined_call_operand.hbm [shape: f32[8,256], index: 6, kind: output, shape index: {}]  }
   0x1   :  { %12 = vsyncpa [#allocation8], 0 }
   0x2   :  { %13 = vsyncpa [#allocation6], 0 }
   0x3   :  { %15 = vsyncpa [#allocation6 + $0x1], 0  ;;  %s805_s21 = smov 0   ;;  %s807_s22 = smov 0  }
   0x4   :  { %s809_s23 = smov 0  }
   0x5 LB: > { %s546_s24 = sadd.s32 4294967295, %s761_s23   ;;  %s547_s25 = sadd.s32 4294967294, %s761_s23   ;;  %s761_s23 = sphi %s809_s23, %s21_s23   ;;  %s757_s22 = sphi %s807_s22, %s976_s22   ;;  %s753_s21 = sphi %s805_s21, %s975_s21  }
   0x6   : > { %s36_s26 = sadd.s32 1, %s757_s22  ;;  %p548_p0 = scmp.ge.s32.totalorder %s761_s23, 1 }
   0x7   : > { %p38_p1 = scmp.ge.s32.totalorder %s36_s26, 2  ;;  %p208_p2 = scmp.lt.s32.totalorder %s761_s23, 3 }
   0x8   : > { %p827_p3 = scmp.eq.s32.totalorder %s546_s24, 0  ;;  %s763_s29 = smov [#allocation4]  }
   0x9   : > { %s978_s26 = smov (%p38_p1, %s36_s26), 0  ;;  %p833_p4 = pnand %p548_p0, %p208_p2 }
   0xa   : > { %s969_s27 = scalar_select %p827_p3, 1, 0 }
   0xb   : > { %s970_s28 = scalar_select %p833_p4, 1, 0 }
   0xc   : > { %s226_s30 = sshll.u32 %s763_s29, 4  ;;  %p587_p5 = pneg %p833_p4  ;;  %s227_s30 = int_to_ptr.vmem [resolvable:$true] %s226_s30 }
   0xd   : > { %s764_s7 = smov [#allocation7]   ;;  %s645_s12 = scalar_lea.hbm %s959_s0, 256 }
   0xe   : > { %s243_s8 = sshll.u32 %s764_s7, 4  ;;  %p841_p6 = pnand %p827_p3, %p587_p5  ;;  %s845_s8 = int_to_ptr.vmem [resolvable:$true] %s243_s8 }
   0xf   : > { %p646_p7 = scmp.ne.s32.totalorder %s959_s0, %s645_s12  ;;  %p652_p11 = scmp.lt.u32.totalorder %s645_s12, %s959_s0 }
  0x10   : > { %p647_p8 = pneg %p841_p6 }
  0x12   : > { %p648_p9 = pnand %p647_p8, %p646_p7 }
  0x14   : > { %p649_p10 = pneg %p648_p9 }
  0x16   : > { %p654_p12 = pnand %p652_p11, %p649_p10 }
  0x18   : > { %657 = shalt.err (!%p654_p12)
}
  0x19   : > { %s658_s17 = scalar_lea.vmem %s227_s30, 256  ;;  %p666_p2 = scmp.lt.s32.totalorder %s227_s30, %s227_s30 }
  0x1a   : > { %p659_p13 = scmp.ne.s32.totalorder %s227_s30, %s658_s17  ;;  %p667_p5 = scmp.lt.s32.totalorder %s658_s17, %s658_s17 }
  0x1c   : > { %p661_p0 = pnand %p659_p13, %p647_p8  ;;  %p668_p3 = por %p667_p5, %p666_p2 }
  0x1e   : > { %p662_p1 = pneg %p661_p0 }
  0x20   : > { %p669_p4 = pnand %p668_p3, %p662_p1 }
  0x22   : > { %672 = shalt.err (!%p669_p4)
}
  0x23   : > { %590 = dma.hbm_to_vmem [thread:$0]  (!%p841_p6), %s959_s0, 256, %s227_s30, [#allocation5]  }
  0x24   : > { %s673_s7 = scalar_lea.hbm %s962_s3, 16 }
  0x25   : > { %p674_p7 = scmp.ne.s32.totalorder %s962_s3, %s673_s7  ;;  %p680_p4 = scmp.lt.u32.totalorder %s673_s7, %s962_s3 }
  0x27   : > { %p676_p9 = pnand %p674_p7, %p647_p8 }
  0x29   : > { %p677_p3 = pneg %p676_p9 }
  0x2b   : > { %p682_p10 = pnand %p680_p4, %p677_p3 }
  0x2d   : > { %685 = shalt.err (!%p682_p10)
}
  0x2e   : > { %s686_s30 = scalar_lea.vmem %s845_s8, 16  ;;  %s693_s14 = scalar_lea.vmem %s845_s8, 32 }
  0x2f   : > { %p687_p11 = scmp.ne.s32.totalorder %s845_s8, %s686_s30  ;;  %p694_p0 = scmp.lt.s32.totalorder %s845_s8, %s845_s8 }
  0x30   : > { %p695_p1 = scmp.lt.s32.totalorder %s693_s14, %s686_s30 }
  0x31   : > { %p689_p12 = pnand %p687_p11, %p647_p8 }
  0x32   : > { %p696_p2 = por %p695_p1, %p694_p0 }
  0x33   : > { %p690_p13 = pneg %p689_p12 }
  0x35   : > { %p697_p5 = pnand %p696_p2, %p690_p13 }
  0x37   : > { %700 = shalt.err (!%p697_p5)
}
  0x38   : > { %593 = dma.hbm_to_vmem [thread:$0]  (!%p841_p6), %s962_s3, 16, %s845_s8, [#allocation8]  }
  0x39   : > { %p972_p7 = scmp.ne.s32.totalorder %s970_s28, 0 }
  0x3a   : > { %p973_p8 = scmp.ne.s32.totalorder (!%p972_p7), %s969_s27, 0 }
  0x3b   : > { %262 = sbr.rel (%p972_p7) target bundleno = 816 (0x330), region = 44 }
  0x42   : > { %740 = dma.done.wait (%p973_p8), [#allocation5], 256  }
  0x43   : > { %742 = vsyncadd (%p973_p8), [#allocation5], 4294967040 }
  0x44   : > { %744 = dma.done.wait (%p973_p8), [#allocation8], 16  }
  0x45   : > { %746 = vsyncadd (%p973_p8), [#allocation8], 4294967280  ;;  %p294_p9 = scmp.eq.s32.totalorder %s753_s21, 0 }
  0x46   : > { %v765_v0 = vmov (%p294_p9), 0.0  }
  0x47   : > { %299 = sbr.rel (!%p294_p9) target bundleno = 78 (0x4e), region = 56  ;;  %300 = vst [vmem:[#allocation2] sm:$0xff] (%p294_p9), %v765_v0 }
  0x4e PF: > { %p555_p6 = scmp.ne.s32.totalorder %s753_s21, 0 }
  0x4f   : > { %v304_v1 = vld [vmem:[#allocation4] sm:$0xff] (!%p555_p6)  ;;  %v305_v2 = vld [vmem:[#allocation4 + $0x8] sm:$0xff] (!%p555_p6)  ;;  %v307_v3 = vld [vmem:[#allocation2] sm:$0xff] (!%p555_p6) }
  0x50   : > { %303 = sbr.rel (%p555_p6) target bundleno = 87 (0x57), region = 60  ;;  %v306_v4 = vadd.f32 (!%p555_p6), %v305_v2, %v304_v1 }
  0x52   : > { %v308_v5 = vadd.f32 (!%p555_p6), %v307_v3, %v306_v4 }
  0x54   : > { %309 = vst [vmem:[#allocation2] sm:$0xff] (!%p555_p6), %v308_v5 }
  0x57 PF: > { %p310_p3 = scmp.eq.s32.totalorder %s753_s21, 1 }
  0x58   : > { %v766_v7 = vmov (%p310_p3), 0.0   ;;  %vm767_vm0 = vmmov (%p310_p3), 0   ;;  %v320_v9 = vld [vmem:[%s961_s2] sm:$0xff] (%p310_p3)  ;;  %vm329_vm1 = vcmask (%p310_p3), 64512   ;;  %vm423_vm2 = vcmask (%p310_p3), 7168  }
  0x59   : > { %314 = sbr.rel (!%p310_p3) target bundleno = 655 (0x28f), region = 64  ;;  %570 = vmatprep.subr.mxu0 (%p310_p3), %v766_v7  ;;  %572 = vmatprep.mubr.msk.f32.mxu0 (%p310_p3), %vm767_vm0, %v766_v7  ;;  %v319_v12 = vld [vmem:[%s960_s1] sm:$0xff] (%p310_p3) }
  0x5a   : > { %v557_v13 = vld [vmem:[#allocation7] ss:$0 sm:$0xff] (%p310_p3) }
  0x5b   : > { %v315_v6 = vld [vmem:[#allocation2] sm:$0xff] (%p310_p3) }
  0x5c   : > { %316 = vadd.xlane.f32.xlu0 (%p310_p3), %v315_v6  ;;  %v410_v21 = vld [vmem:[%s963_s4] sm:$0xff] (%p310_p3) }
  0x5d   : > { %v415_v25 = vld [vmem:[%s964_s5] sm:$0xff] (%p310_p3) }
  0xe9   : > { %v317_v8 = vpop.xlane.xlu0 %316 }
  0xea   : > { %v318_v10 = vmul.f32 0.00390625, %v317_v8 }
  0xec   : > { %v321_v11 = vmul.f32 %v320_v9, %v318_v10 }
  0xee   : > { %571 = vmatpush3.msra.mxu0 %v321_v11 }
  0xef   : > { %573 = vmatmul.mubr.msk.f32.vlgmr.msra.gmra.mrb[0].mxu0 %vm329_vm1, %v319_v12 }
 0x1c2   : > { %v399_v14 = vpop.f32.mrb[0].mxu0 }
 0x1c3   : > { %v400_v15 = vadd.f32 %v557_v13, %v399_v14  ;;  %v574_v16 = vpop.f32.mrb[1].mxu0 }
 0x1c5   : > { %v559_v17 = vmul.f32 -1.442695, %v400_v15 }
 0x1c7   : > { %636 = vpow2.f32 %v559_v17 }
 0x1d1   : > { %v637_v18 = vpop.eup %636 }
 0x1d2   : > { %v406_v19 = vadd.f32 1.0, %v637_v18 }
 0x1d4   : > { %638 = vrcp.f32 %v406_v19 }
 0x1de   : > { %v639_v20 = vpop.eup %638 }
 0x1df   : > { %v409_v22 = vmul.f32 %v639_v20, %v400_v15 }
 0x1e1   : > { %v411_v23 = vmul.f32 %v410_v21, %v409_v22 }
 0x1e3   : > { %v412_v24 = vsel %vm329_vm1, %v411_v23, 0.0 }
 0x1e4   : > { %413 = vadd.xlane.f32.xlu0 %v412_v24 }
 0x271   : > { %v414_v26 = vpop.xlane.xlu0 %413 }
 0x272   : > { %v416_v27 = vadd.f32 %v415_v25, %v414_v26 }
 0x274   : > { %v560_v28 = vmul.f32 -1.442695, %v416_v27 }
 0x276   : > { %640 = vpow2.f32 %v560_v28 }
 0x280   : > { %v641_v29 = vpop.eup %640 }
 0x281   : > { %v420_v30 = vadd.f32 1.0, %v641_v29 }
 0x283   : > { %642 = vrcp.f32 %v420_v30 }
 0x28d   : > { %v643_v31 = vpop.eup %642 }
 0x28e   : > { %424 = vst.msk [vmem:[#allocation3] sm:$0xff] %vm423_vm2, %v643_v31 }
 0x28f PF: > { %p561_p4 = scmp.ne.s32.totalorder %s753_s21, 1 }
 0x290   : > { %v768_v33 = vmov (!%p561_p4), 0   ;;  %v429_v34 = vld [vmem:[#allocation4] sm:$0xff] (!%p561_p4)  ;;  %v430_v35 = vld [vmem:[#allocation4 + $0x8] sm:$0xff] (!%p561_p4) }
 0x291   : > { %427 = sbr.rel (%p561_p4) target bundleno = 793 (0x319), region = 68  ;;  %644 = vset.pattern.permute.xlu0 (!%p561_p4), %v768_v33 }
 0x295   : > { %v428_v32 = vld [vmem:[#allocation3] sm:$0xff] (!%p561_p4) }
 0x296   : > { %433 = vperm.xlu0 (!%p561_p4), %644, %v428_v32  }
 0x315   : > { %v434_v36 = vpop.permute.xlu0 %433 }
 0x316   : > { %v436_v37 = vmul.f32 %v434_v36, %v429_v34  ;;  %v437_v38 = vmul.f32 %v434_v36, %v430_v35 }
 0x318   : > { %438 = vst [vmem:[#allocation9] sm:$0xff] %v436_v37  ;;  %439 = vst [vmem:[#allocation9 + $0x8] sm:$0xff] %v437_v38 }
 0x319 PF: > { %p925_p10 = scmp.eq.s32.totalorder %s546_s24, 1  ;;  %s769_s21 = smov [#allocation9]  }
 0x31a   : > { %s458_s7 = sshll.u32 %s769_s21, 4  ;;  %s459_s7 = int_to_ptr.vmem [resolvable:$true] %s458_s7 }
 0x31b   : > { %s701_s10 = scalar_lea.vmem %s459_s7, 256  ;;  %s707_s11 = scalar_lea.vmem %s459_s7, 512 }
 0x31c   : > { %p702_p11 = scmp.ne.s32.totalorder %s459_s7, %s701_s10  ;;  %p708_p0 = scmp.lt.s32.totalorder %s459_s7, %s459_s7 }
 0x31d   : > { %p709_p1 = scmp.lt.s32.totalorder %s707_s11, %s701_s10 }
 0x31e   : > { %p703_p12 = pnand %p702_p11, %p925_p10 }
 0x31f   : > { %p710_p2 = por %p709_p1, %p708_p0 }
 0x320   : > { %p704_p13 = pneg %p703_p12 }
 0x322   : > { %p711_p5 = pnand %p710_p2, %p704_p13 }
 0x324   : > { %714 = shalt.err (!%p711_p5)
}
 0x325   : > { %s715_s13 = scalar_lea.hbm %s965_s6, 256 }
 0x326   : > { %p716_p7 = scmp.ne.s32.totalorder %s965_s6, %s715_s13  ;;  %p721_p6 = scmp.lt.u32.totalorder %s715_s13, %s965_s6 }
 0x328   : > { %p717_p8 = pnand %p716_p7, %p925_p10 }
 0x32a   : > { %p718_p9 = pneg %p717_p8 }
 0x32c   : > { %p723_p3 = pnand %p721_p6, %p718_p9 }
 0x32e   : > { %726 = shalt.err (!%p723_p3)
}
 0x32f   : > { %584 = dma.vmem_to_hbm [thread:$0]  (%p925_p10), %s459_s7, 256, %s965_s6, [#allocation6]  }
 0x330 PF: > { %p603_p4 = scmp.ge.s32.totalorder %s761_s23, 2  ;;  %p604_p11 = scmp.eq.s32.totalorder %s547_s25, 1 }
 0x332   : > { %p595_p12 = pnand %p604_p11, %p603_p4 }
 0x334   : > { %748 = dma.done.wait (!%p595_p12), [#allocation6], 256  }
 0x335   : > { %750 = vsyncadd (!%p595_p12), [#allocation6], 4294967040  ;;  %s21_s23 = sadd.s32 1, %s761_s23   ;;  %s975_s21 = smov %s757_s22 }
 0x336   : > { %p18_p13 = scmp.ge.s32.totalorder %s21_s23, 4   ;;  %s976_s22 = smov %s978_s26 }
 0x338   :  { %20 = sbr.rel (!%p18_p13) target bundleno = 5 (0x5), region = 102 }
 0x33f   :  { %476 = vsyncpa [#allocation5], 1 }
 0x340   :  { %478 = vsyncpa [#allocation5 + $0x1], 1 }
 0x341   :  { %479 = vsyncpa [#allocation8], 1 }
 0x342   :  { %480 = vsyncpa [#allocation6], 1 }
 0x343   :  { %482 = vsyncpa [#allocation6 + $0x1], 1 }

</bundles_post_ra>
